<compile_context>
chip_gen: v7x
topology: tpu7x:2x2x1
jax: 0.10.0
libtpu: 0.0.40
codegen_flags: <defaults>
</compile_context>

<pallas_src>
import functools

import jax
import jax.numpy as jnp
from jax.experimental import pallas as pl
from jax.experimental.pallas import tpu as pltpu

LANE = 128
SUBLANE = 8


def _dice_partial_kernel(x_ref, t_ref, inter_ref, sum_ref, *,
                         n_valid, tile_rows, needs_mask):
    """One grid step: partial sums for one (tile_rows, 128) tile.

    x_ref:     (tile_rows, LANE) logits (any float dtype)
    t_ref:     (tile_rows, LANE) targets (any float dtype)
    inter_ref: (1, SUBLANE, LANE) f32 partial sum of sigmoid(x) * t
    sum_ref:   (1, SUBLANE, LANE) f32 partial sum of sigmoid(x) + t
    """
    p = jax.nn.sigmoid(x_ref[...].astype(jnp.float32))
    t = t_ref[...].astype(jnp.float32)

    if needs_mask:
        # Mask out padded elements and any rows of a partial last block that
        # fall outside the (rows, LANE) array (their VMEM contents are
        # unspecified). Element indices fit in int32 for any realistic size.
        i = pl.program_id(0)
        row = jax.lax.broadcasted_iota(jnp.int32, p.shape, 0)
        lane = jax.lax.broadcasted_iota(jnp.int32, p.shape, 1)
        elem = (i * tile_rows + row) * LANE + lane  # global flat element index
        valid = elem < n_valid
        p = jnp.where(valid, p, 0.0)
        t = jnp.where(valid, t, 0.0)

    # In-tile reduction down to a single (8, 128) vreg per quantity. Summing
    # over the leading axis of (tile_rows//8, 8, 128) is pure elementwise VPU
    # adds — no cross-lane XLU work and no SMEM scalar accumulation.
    pt = (p * t).reshape(-1, SUBLANE, LANE).sum(axis=0)
    s = (p + t).reshape(-1, SUBLANE, LANE).sum(axis=0)
    inter_ref[0] = pt
    sum_ref[0] = s


def dice_loss(inputs, targets, smooth=1.0, tile_rows=4096):
    """Pallas DiceLoss forward. inputs: logits, targets: (binary) targets of the
    same shape (any layout, e.g. NCHW). Returns a scalar float32 loss."""
    n = inputs.size
    x = inputs.reshape(-1)
    t = targets.reshape(-1)

    # Keep dtypes narrow on the HBM side (accumulation is f32 in-kernel).
    # Non-float targets (bool / int 0-1 masks) are fed as bf16 (exact for 0/1).
    if not jnp.issubdtype(x.dtype, jnp.floating):
        x = x.astype(jnp.float32)
    if not jnp.issubdtype(t.dtype, jnp.floating):
        t = t.astype(jnp.bfloat16)

    # Pad (only when needed) so the flat array reshapes to (rows, 128) with
    # rows a multiple of 8. The pad value is irrelevant: it is masked in-kernel.
    pad = (-n) % (SUBLANE * LANE)
    if pad:
        x = jnp.concatenate([x, jnp.zeros((pad,), x.dtype)])
        t = jnp.concatenate([t, jnp.zeros((pad,), t.dtype)])

    rows = (n + pad) // LANE
    x = x.reshape(rows, LANE)
    t = t.reshape(rows, LANE)

    # Legalize tile_rows: positive multiple of SUBLANE, no larger than rows
    # (rows is itself a multiple of SUBLANE).
    tile_rows = max(SUBLANE, (int(tile_rows) // SUBLANE) * SUBLANE)
    tile_rows = min(tile_rows, rows)
    num_tiles = pl.cdiv(rows, tile_rows)
    needs_mask = (pad != 0) or (rows % tile_rows != 0)

    kernel = functools.partial(
        _dice_partial_kernel,
        n_valid=n, tile_rows=tile_rows, needs_mask=needs_mask)

    partial_shape = jax.ShapeDtypeStruct((num_tiles, SUBLANE, LANE), jnp.float32)
    inter_part, sum_part = pl.pallas_call(
        kernel,
        out_shape=(partial_shape, partial_shape),
        grid_spec=pltpu.PrefetchScalarGridSpec(
            num_scalar_prefetch=0,
            grid=(num_tiles,),
            in_specs=[
                pl.BlockSpec((tile_rows, LANE), lambda i: (i, 0)),
                pl.BlockSpec((tile_rows, LANE), lambda i: (i, 0)),
            ],
            out_specs=[
                pl.BlockSpec((1, SUBLANE, LANE), lambda i: (i, 0, 0)),
                pl.BlockSpec((1, SUBLANE, LANE), lambda i: (i, 0, 0)),
            ],
        ),
        compiler_params=pltpu.CompilerParams(
            # No cross-step carried state -> grid axis can be sharded across
            # TensorCores (2x on v7x; neutral on single-TC v5e/v6e).
            dimension_semantics=("parallel",),
        ),
    )(x, t)

    # Tiny final combine (a few KiB of partials) in plain JAX.
    intersection = jnp.sum(inter_part)
    sum_p_plus_t = jnp.sum(sum_part)
    dice = (2.0 * intersection + smooth) / (sum_p_plus_t + smooth)
    return (1.0 - dice).astype(jnp.float32)


def dice_loss_ref(inputs, targets, smooth=1.0):
    p = jax.nn.sigmoid(inputs.astype(jnp.float32)).reshape(-1)
    t = targets.astype(jnp.float32).reshape(-1)
    inter = jnp.sum(p * t)
    dice = (2.0 * inter + smooth) / (jnp.sum(p) + jnp.sum(t) + smooth)
    return 1.0 - dice


if __name__ == "__main__":
    key = jax.random.PRNGKey(0)
    k1, k2, k3, k4 = jax.random.split(key, 4)

    # Segmentation-style inputs: NCHW logits + binary mask.
    x = jax.random.normal(k1, (2, 4, 16, 16), dtype=jnp.float32)
    mask = jax.random.uniform(k2, (2, 4, 16, 16)) > 0.5

    # Main check: bf16 targets (exact for a 0/1 mask, halves the target stream).
    loss = jax.block_until_ready(dice_loss(x, mask.astype(jnp.bfloat16), smooth=1.0))
    ref = jax.block_until_ready(dice_loss_ref(x, mask.astype(jnp.float32), smooth=1.0))
    assert jnp.allclose(loss, ref, rtol=1e-5, atol=1e-5), (loss, ref)

    # Ragged shape: exercises the pad + in-kernel mask path (3*5*11*13 = 2145).
    x2 = jax.random.normal(k3, (3, 5, 11, 13), dtype=jnp.float32)
    t2 = (jax.random.uniform(k4, (3, 5, 11, 13)) > 0.5).astype(jnp.float32)
    loss2 = jax.block_until_ready(dice_loss(x2, t2, smooth=1.0))
    ref2 = jax.block_until_ready(dice_loss_ref(x2, t2, smooth=1.0))
    assert jnp.allclose(loss2, ref2, rtol=1e-5, atol=1e-5), (loss2, ref2)

    # Multi-step grid with a partial (masked) last block.
    loss3 = jax.block_until_ready(dice_loss(x2, t2, smooth=1.0, tile_rows=16))
    assert jnp.allclose(loss3, ref2, rtol=1e-5, atol=1e-5), (loss3, ref2)

    print("KERNEL_OK")
</pallas_src>

<mosaic_0001>
module attributes {stable_mosaic.version = 11 : i64} {
  func.func @_dice_partial_kernel(%arg0: i32, %arg1: memref<16x128xf32, #tpu.memory_space<vmem>>, %arg2: memref<16x128xbf16, #tpu.memory_space<vmem>>, %arg3: memref<1x8x128xf32, #tpu.memory_space<vmem>>, %arg4: memref<1x8x128xf32, #tpu.memory_space<vmem>>) attributes {dimension_semantics = [#tpu.dimension_semantics<parallel>], iteration_bounds = array<i64: 1>, scalar_prefetch = 0 : i64, scratch_operands = 0 : i64, tpu.core_type = #tpu.core_type<tc>, window_params = [{transform_indices = @transform_0, window_bounds = array<i64: 16, 128>}, {transform_indices = @transform_1, window_bounds = array<i64: 16, 128>}, {transform_indices = @transform_2, window_bounds = array<i64: 1, 8, 128>}, {transform_indices = @transform_3, window_bounds = array<i64: 1, 8, 128>}]} {
    %c0 = arith.constant 0 : index
    %c0_0 = arith.constant 0 : index
    %0 = vector.load %arg1[%c0, %c0_0] : memref<16x128xf32, #tpu.memory_space<vmem>>, vector<16x128xf32>
    %1 = arith.negf %0 : vector<16x128xf32>
    %2 = math.exp %1 : vector<16x128xf32>
    %cst = arith.constant 1.000000e+00 : f32
    %3 = vector.broadcast %cst : f32 to vector<16x128xf32>
    %4 = arith.addf %3, %2 : vector<16x128xf32>
    %5 = arith.divf %3, %4 : vector<16x128xf32>
    %c0_1 = arith.constant 0 : index
    %c0_2 = arith.constant 0 : index
    %6 = vector.load %arg2[%c0_1, %c0_2] : memref<16x128xbf16, #tpu.memory_space<vmem>>, vector<16x128xbf16>
    %7 = arith.extf %6 : vector<16x128xbf16> to vector<16x128xf32>
    %8 = arith.mulf %5, %7 : vector<16x128xf32>
    %9 = vector.shape_cast %8 : vector<16x128xf32> to vector<2x8x128xf32>
    %cst_3 = arith.constant dense<0.000000e+00> : vector<8x128xf32>
    %10 = vector.multi_reduction <add>, %9, %cst_3 [0] : vector<2x8x128xf32> to vector<8x128xf32>
    %11 = arith.addf %5, %7 : vector<16x128xf32>
    %12 = vector.shape_cast %11 : vector<16x128xf32> to vector<2x8x128xf32>
    %cst_4 = arith.constant dense<0.000000e+00> : vector<8x128xf32>
    %13 = vector.multi_reduction <add>, %12, %cst_4 [0] : vector<2x8x128xf32> to vector<8x128xf32>
    %c0_5 = arith.constant 0 : index
    %c0_6 = arith.constant 0 : index
    %c0_7 = arith.constant 0 : index
    %14 = vector.load %arg3[%c0_5, %c0_6, %c0_7] : memref<1x8x128xf32, #tpu.memory_space<vmem>>, vector<1x8x128xf32>
    %15 = vector.shape_cast %14 : vector<1x8x128xf32> to vector<8x128xf32>
    %16 = vector.shape_cast %10 : vector<8x128xf32> to vector<1x8x128xf32>
    tpu.vector_store %arg3[%c0_5, %c0_6, %c0_7], %16 {strides = array<i32>} : memref<1x8x128xf32, #tpu.memory_space<vmem>>, vector<1x8x128xf32>,
    %c0_8 = arith.constant 0 : index
    %c0_9 = arith.constant 0 : index
    %c0_10 = arith.constant 0 : index
    %17 = vector.load %arg4[%c0_8, %c0_9, %c0_10] : memref<1x8x128xf32, #tpu.memory_space<vmem>>, vector<1x8x128xf32>
    %18 = vector.shape_cast %17 : vector<1x8x128xf32> to vector<8x128xf32>
    %19 = vector.shape_cast %13 : vector<8x128xf32> to vector<1x8x128xf32>
    tpu.vector_store %arg4[%c0_8, %c0_9, %c0_10], %19 {strides = array<i32>} : memref<1x8x128xf32, #tpu.memory_space<vmem>>, vector<1x8x128xf32>,
    return
  }
  func.func @transform_0(%arg0: i32) -> (i32, i32) {
    %c0_i32 = arith.constant 0 : i32
    %c0_i32_0 = arith.constant 0 : i32
    return %arg0, %c0_i32 : i32, i32
  }
  func.func @transform_1(%arg0: i32) -> (i32, i32) {
    %c0_i32 = arith.constant 0 : i32
    %c0_i32_0 = arith.constant 0 : i32
    return %arg0, %c0_i32 : i32, i32
  }
  func.func @transform_2(%arg0: i32) -> (i32, i32, i32) {
    %c0_i32 = arith.constant 0 : i32
    %c0_i32_0 = arith.constant 0 : i32
    %c0_i32_1 = arith.constant 0 : i32
    return %arg0, %c0_i32, %c0_i32_0 : i32, i32, i32
  }
  func.func @transform_3(%arg0: i32) -> (i32, i32, i32) {
    %c0_i32 = arith.constant 0 : i32
    %c0_i32_0 = arith.constant 0 : i32
    %c0_i32_1 = arith.constant 0 : i32
    return %arg0, %c0_i32, %c0_i32_0 : i32, i32, i32
  }
}

</mosaic_0001>

<bundles_post_ra>
// kernel: tpu_custom_call.1
= control target key start
LH: loop header
LB: loop body
LE: loop exit
PB: predicated region body
PF: predicated region fallthrough
CT: control target
= control target key end

     0   :  { %9 = vsyncpa [#allocation3], 0  ;;  %s293_s0 = inlined_call_operand.hbm [shape: f32[16,128], index: 0, kind: input, shape index: {}]   ;;  %s294_s1 = inlined_call_operand.hbm [shape: bf16[16,128], index: 1, kind: input, shape index: {}]   ;;  %s295_s2 = inlined_call_operand.hbm [shape: f32[1,8,128], index: 2, kind: output, shape index: {0}]   ;;  %s296_s3 = inlined_call_operand.hbm [shape: f32[1,8,128], index: 3, kind: output, shape index: {1}]  }
   0x1   :  { %10 = vsyncpa [#allocation6], 0 }
   0x2   :  { %11 = vsyncpa [#allocation4], 0 }
   0x3   :  { %12 = vsyncpa [#allocation9], 0  ;;  %s217_s12 = smov [#allocation2]   ;;  %s121_s16 = scalar_lea.hbm %s293_s0, 256 }
   0x4   :  { %s18_s13 = sshll.u32 %s217_s12, 4  ;;  %p122_p0 = scmp.ne.s32.totalorder %s293_s0, %s121_s16  ;;  %s19_s13 = int_to_ptr.vmem [resolvable:$true] %s18_s13 }
   0x5   :  { %p125_p1 = scmp.lt.u32.totalorder %s121_s16, %s293_s0 }
   0x7   :  { %p127_p2 = pnand %p125_p1, %p122_p0 }
   0x9   :  { %130 = shalt.err (!%p127_p2)
}
   0xa   :  { %s131_s21 = scalar_lea.vmem %s19_s13, 256  ;;  %p136_p4 = scmp.lt.s32.totalorder %s19_s13, %s19_s13 }
   0xb   :  { %p132_p3 = scmp.ne.s32.totalorder %s19_s13, %s131_s21  ;;  %p137_p5 = scmp.lt.s32.totalorder %s131_s21, %s131_s21 }
   0xd   :  { %p138_p6 = por %p137_p5, %p136_p4 }
   0xf   :  { %p139_p7 = pnand %p138_p6, %p132_p3 }
  0x11   :  { %142 = shalt.err (!%p139_p7)
}
  0x12   :  { %s218_s22 = smov 128   ;;  %s219_s23 = smov 8  }
  0x13   :  { %24 = dma.hbm_to_vmem [thread:$0]  %s293_s0, 256, %s19_s13, [#allocation3], %s218_s22, %s218_s22, %s219_s23  }
  0x14   :  { %s220_s26 = smov [#allocation5]   ;;  %s143_s30 = scalar_lea.hbm %s294_s1, 128 }
  0x15   :  { %s30_s27 = sshll.u32 %s220_s26, 4  ;;  %p144_p8 = scmp.ne.s32.totalorder %s294_s1, %s143_s30  ;;  %s31_s27 = int_to_ptr.vmem [resolvable:$true] %s30_s27 }
  0x16   :  { %p147_p9 = scmp.lt.u32.totalorder %s143_s30, %s294_s1 }
  0x18   :  { %p149_p10 = pnand %p147_p9, %p144_p8 }
  0x1a   :  { %152 = shalt.err (!%p149_p10)
}
  0x1b   :  { %s153_s8 = scalar_lea.vmem %s31_s27, 128  ;;  %p158_p12 = scmp.lt.s32.totalorder %s31_s27, %s31_s27 }
  0x1c   :  { %p154_p11 = scmp.ne.s32.totalorder %s31_s27, %s153_s8  ;;  %p159_p13 = scmp.lt.s32.totalorder %s153_s8, %s153_s8 }
  0x1e   :  { %p160_p0 = por %p159_p13, %p158_p12 }
  0x20   :  { %p161_p1 = pnand %p160_p0, %p154_p11 }
  0x22   :  { %164 = shalt.err (!%p161_p1)
}
  0x23   :  { %s221_s0 = smov 64   ;;  %s222_s9 = smov 4  }
  0x24   :  { %36 = dma.hbm_to_vmem [thread:$0]  %s294_s1, 128, %s31_s27, [#allocation6], %s221_s0, %s221_s0, %s222_s9  }
  0x25   :  { %209 = dma.done.wait [#allocation3], 256  }
  0x26   :  { %210 = vsyncadd [#allocation3], 4294967040 }
  0x27   :  { %211 = dma.done.wait [#allocation6], 128  }
  0x28   :  { %212 = vsyncadd [#allocation6], 4294967168  ;;  %v43_v0 = vld [vmem:[#allocation2] sm:$0xff]  ;;  %v44_v1 = vld [vmem:[#allocation2 + $0x8] sm:$0xff]  ;;  %s223_s1 = smov [#allocation7]   ;;  %s224_s13 = smov [#allocation8]  }
  0x29   :  { %v99_v2 = vmul.f32 -1.442695, %v43_v0  ;;  %v100_v3 = vmul.f32 -1.442695, %v44_v1  ;;  %v102_v8 = vld [vmem:[#allocation5] sm:$0xff]   ;;  %s75_s12 = sshll.u32 %s223_s1, 4  ;;  %s76_s12 = int_to_ptr.vmem [resolvable:$true] %s75_s12 }
  0x2a   :  { %v103_v9 = vunpack.c.l.bf16 %v102_v8  ;;  %v104_v10 = vunpack.c.h.bf16 %v102_v8  ;;  %s85_s14 = sshll.u32 %s224_s13, 4  ;;  %s165_s15 = scalar_lea.vmem %s76_s12, 128  ;;  %s86_s14 = int_to_ptr.vmem [resolvable:$true] %s85_s14 }
  0x2b   :  { %113 = vpow2.f32 %v99_v2  ;;  %p166_p2 = scmp.ne.s32.totalorder %s76_s12, %s165_s15  ;;  %p170_p3 = scmp.lt.s32.totalorder %s76_s12, %s76_s12 }
  0x2c   :  { %115 = vpow2.f32 %v100_v3  ;;  %p171_p4 = scmp.lt.s32.totalorder %s165_s15, %s165_s15 }
  0x2e   :  { %p172_p5 = por %p171_p4, %p170_p3 }
  0x30   :  { %p173_p6 = pnand %p172_p5, %p166_p2 }
  0x35   :  { %v114_v4 = vpop.eup %113 }
  0x36   :  { %v116_v5 = vpop.eup %115  ;;  %v51_v6 = vadd.f32 1.0, %v114_v4 }
  0x37   :  { %v52_v7 = vadd.f32 1.0, %v116_v5 }
  0x38   :  { %117 = vrcp.f32 %v51_v6 }
  0x39   :  { %119 = vrcp.f32 %v52_v7 }
  0x42   :  { %v118_v11 = vpop.eup %117 }
  0x43   :  { %v120_v12 = vpop.eup %119  ;;  %v61_v13 = vmul.f32 %v118_v11, %v103_v9  ;;  %v64_v14 = vadd.f32 %v118_v11, %v103_v9 }
  0x44   :  { %v62_v15 = vmul.f32 %v120_v12, %v104_v10  ;;  %v65_v16 = vadd.f32 %v120_v12, %v104_v10 }
  0x46   :  { %v63_v17 = vadd.f32 %v62_v15, %v61_v13  ;;  %v66_v18 = vadd.f32 %v65_v16, %v64_v14 }
  0x48   :  { %67 = vst [vmem:[#allocation7] sm:$0xff] %v63_v17  ;;  %68 = vst [vmem:[#allocation8] sm:$0xff] %v66_v18 }
  0x49   :  { %176 = shalt.err (!%p173_p6)
}
  0x4a   :  { %s177_s18 = scalar_lea.hbm %s295_s2, 128 }
  0x4b   :  { %p178_p7 = scmp.ne.s32.totalorder %s295_s2, %s177_s18  ;;  %p181_p8 = scmp.lt.u32.totalorder %s177_s18, %s295_s2 }
  0x4d   :  { %p183_p9 = pnand %p181_p8, %p178_p7 }
  0x4f   :  { %186 = shalt.err (!%p183_p9)
}
  0x50   :  { %78 = dma.vmem_to_hbm [thread:$0]  %s76_s12, 128, %s295_s2, [#allocation4]  }
  0x51   :  { %s187_s25 = scalar_lea.vmem %s86_s14, 128  ;;  %p192_p11 = scmp.lt.s32.totalorder %s86_s14, %s86_s14 }
  0x52   :  { %p188_p10 = scmp.ne.s32.totalorder %s86_s14, %s187_s25  ;;  %p193_p12 = scmp.lt.s32.totalorder %s187_s25, %s187_s25 }
  0x54   :  { %p194_p13 = por %p193_p12, %p192_p11 }
  0x56   :  { %p195_p0 = pnand %p194_p13, %p188_p10 }
  0x58   :  { %198 = shalt.err (!%p195_p0)
}
  0x59   :  { %s199_s28 = scalar_lea.hbm %s296_s3, 128 }
  0x5a   :  { %p200_p1 = scmp.ne.s32.totalorder %s296_s3, %s199_s28  ;;  %p203_p2 = scmp.lt.u32.totalorder %s199_s28, %s296_s3 }
  0x5c   :  { %p205_p3 = pnand %p203_p2, %p200_p1 }
  0x5e   :  { %208 = shalt.err (!%p205_p3)
}
  0x5f   :  { %88 = dma.vmem_to_hbm [thread:$0]  %s86_s14, 128, %s296_s3, [#allocation9]  }
  0x60   :  { %213 = dma.done.wait [#allocation4], 128  }
  0x61   :  { %214 = vsyncadd [#allocation4], 4294967168 }
  0x62   :  { %215 = dma.done.wait [#allocation9], 128  }
  0x63   :  { %216 = vsyncadd [#allocation9], 4294967168 }
  0x64   :  { %95 = vsyncpa [#allocation3], 1 }
  0x65   :  { %96 = vsyncpa [#allocation6], 1 }
  0x66   :  { %97 = vsyncpa [#allocation4], 1 }
  0x67   :  { %98 = vsyncpa [#allocation9], 1 }

</bundles_post_ra>
